<compile_context>
chip_gen: v7x
topology: tpu7x:2x2x1
jax: 0.10.0
libtpu: 0.0.40
codegen_flags: <defaults>
</compile_context>

<pallas_src>
import jax
import jax.numpy as jnp
from jax.experimental import pallas as pl
from jax.experimental.pallas import tpu as pltpu

BN_EPS = 1e-5


# ----------------------------------------------------------------------------
# Fused Pallas kernel: in-kernel aggregation + projections + ReLU, final Linear
# ----------------------------------------------------------------------------
def _make_fused_kernel(num_convs, n_nodes, batch, emb_dim):
    """Kernel ref order:
       x, a_big, (w_rel_l, w_root_l, bias_l) * num_convs, fc_w(HBM), fc_b, out,
       fc_w VMEM scratch, DMA semaphore."""
    def kernel(*refs):
        x_ref, adj_ref = refs[0], refs[1]
        base = 2
        fcw_hbm = refs[base + 3 * num_convs]
        fcb_ref = refs[base + 3 * num_convs + 1]
        o_ref = refs[base + 3 * num_convs + 2]
        fcw_vmem = refs[base + 3 * num_convs + 3]
        fc_sem = refs[base + 3 * num_convs + 4]

        # Prefetch the dominant FC weight HBM -> VMEM underneath the conv-stack compute.
        fc_copy = pltpu.make_async_copy(fcw_hbm, fcw_vmem, fc_sem)
        fc_copy.start()

        a_big = adj_ref[...]                      # (B*N, B*N) bf16 = kron(adj, I_B)
        h = x_ref[...]                            # (B*N, Fin) f32, node-major rows (n, b)
        for l in range(num_convs):
            w_rel = refs[base + 3 * l][...]       # (F_l, E) bf16, BN-folded
            w_root = refs[base + 3 * l + 1][...]  # (F_l, E) bf16, BN-folded
            bias = refs[base + 3 * l + 2][...]    # (1, E)  f32, BN-folded
            h16 = h.astype(jnp.bfloat16)
            # GraphConv sum-aggregation: one (B*N, B*N) @ (B*N, F_l) MXU matmul.
            agg = jnp.dot(a_big, h16, preferred_element_type=jnp.float32)
            z = (jnp.dot(agg.astype(jnp.bfloat16), w_rel,
                         preferred_element_type=jnp.float32)
                 + jnp.dot(h16, w_root, preferred_element_type=jnp.float32)
                 + bias)                          # f32 epilogue
            h = jnp.maximum(z, 0.0)               # ReLU; dropout is identity (eval mode)

        fc_copy.wait()                            # FC weight is now resident in VMEM
        h16 = h.astype(jnp.bfloat16)              # (B*N, E)
        o_pad = fcw_vmem.shape[1]
        acc = jnp.zeros((batch, o_pad), jnp.float32)
        # Final Linear on the (B, N*E)-flattened activations, written as a sum of
        # per-node (B, E) @ (E, O_pad) blocks -> no in-kernel reshape / transpose.
        for n in range(n_nodes):
            acc = acc + jnp.dot(h16[n * batch:(n + 1) * batch, :],
                                fcw_vmem[n * emb_dim:(n + 1) * emb_dim, :],
                                preferred_element_type=jnp.float32)
        o_ref[...] = acc + fcb_ref[...]           # lane-dense (B, O_pad) store
    return kernel


# ----------------------------------------------------------------------------
# One-time (per adjacency / batch size) preparation, OUTSIDE the jitted path
# ----------------------------------------------------------------------------
def edge_index_to_dense_adj(edge_index, num_nodes):
    # adj[dst, src] = 1.0  (sum aggregation of source features onto the target node)
    src, dst = edge_index[0], edge_index[1]
    adj = jnp.zeros((num_nodes, num_nodes), jnp.float32)
    return adj.at[dst, src].add(1.0)


def prepare_flexgcn(params, edge_index, node_count, batch_size):
    """Fold eval-mode BN into the GraphConv weights, build the block-diagonal adjacency,
    cast weights to bf16 and lane-pad the FC weight.  Done once, not per forward call."""
    adj = edge_index_to_dense_adj(edge_index, node_count)              # (N, N) f32
    eye_b = jnp.eye(batch_size, dtype=jnp.float32)
    a_big = jnp.kron(adj, eye_b).astype(jnp.bfloat16)                  # (N*B, N*B)

    layers = []
    for conv_p, bn_p in zip(params["convs"], params["bns"]):
        s = bn_p["gamma"] * jax.lax.rsqrt(bn_p["var"] + BN_EPS)        # (E,)
        layers.append({
            "w_rel": (conv_p["w_rel"] * s[None, :]).astype(jnp.bfloat16),
            "w_root": (conv_p["w_root"] * s[None, :]).astype(jnp.bfloat16),
            "bias": (((conv_p["b_rel"] - bn_p["mean"]) * s
                      + bn_p["beta"])[None, :]).astype(jnp.float32),
        })

    fc_w, fc_b = params["fc_w"], params["fc_b"]                        # (N*E, O), (O,)
    o = fc_w.shape[1]
    o_pad = ((o + 127) // 128) * 128                                   # lane-dense output
    fc_w_pad = (jnp.zeros((fc_w.shape[0], o_pad), jnp.bfloat16)
                .at[:, :o].set(fc_w.astype(jnp.bfloat16)))
    fc_b_pad = jnp.zeros((1, o_pad), jnp.float32).at[:, :o].set(fc_b)

    return {"a_big": a_big, "layers": layers, "fc_w": fc_w_pad, "fc_b": fc_b_pad}


# ----------------------------------------------------------------------------
# Per-call forward: flatten to node-major rows + single grid-less pallas_call
# ----------------------------------------------------------------------------
def flexgcn_forward(prep, x):
    B, N, f_in = x.shape
    num_convs = len(prep["layers"])
    emb = prep["layers"][-1]["bias"].shape[1]
    ne, o_pad = prep["fc_w"].shape
    assert ne == N * emb

    # Node-major (n, b) row ordering: aggregation uses kron(adj, I_B) and the final Linear
    # uses contiguous per-node row blocks, so the kernel needs no reshapes.
    x_flat = jnp.transpose(x, (1, 0, 2)).reshape(N * B, f_in)

    inputs = [x_flat, prep["a_big"]]
    for lyr in prep["layers"]:
        inputs += [lyr["w_rel"], lyr["w_root"], lyr["bias"]]
    inputs += [prep["fc_w"], prep["fc_b"]]

    vmem = pl.BlockSpec(memory_space=pltpu.MemorySpace.VMEM)
    # Everything lives whole-array in VMEM except fc_w, which stays in HBM (pl.ANY) and is
    # prefetched manually inside the kernel under the conv-stack compute.
    in_specs = [vmem] * (len(inputs) - 2) + [pl.BlockSpec(memory_space=pl.ANY), vmem]

    # Advisory cost estimate, generic in num_convs and the actual per-layer shapes.
    flops = 0
    fin = f_in
    for lyr in prep["layers"]:
        e = lyr["bias"].shape[1]
        flops += 2 * (B * N) * (B * N) * fin        # block-diag adjacency aggregation
        flops += 2 * 2 * (B * N) * fin * e          # rel + root projections
        fin = e
    flops += 2 * B * ne * o_pad                     # final Linear
    bytes_accessed = (sum(int(a.size) * a.dtype.itemsize for a in inputs)
                      + B * o_pad * 4)

    fused = pl.pallas_call(
        _make_fused_kernel(num_convs, N, B, emb),
        out_shape=jax.ShapeDtypeStruct((B, o_pad), jnp.float32),
        in_specs=in_specs,
        out_specs=pl.BlockSpec(memory_space=pltpu.MemorySpace.VMEM),
        scratch_shapes=[pltpu.VMEM((ne, o_pad), jnp.bfloat16),
                        pltpu.SemaphoreType.DMA],
        cost_estimate=pl.CostEstimate(flops=int(flops), transcendentals=0,
                                      bytes_accessed=int(bytes_accessed)),
    )
    return fused(*inputs)


# ----------------------------------------------------------------------------
# Parameter init & pure-JAX reference (original, unfolded f32 semantics)
# ----------------------------------------------------------------------------
def init_flexgcn_params(key, node_count, node_feature_count, node_embedding_dim,
                        output_dim, num_convs=2):
    params = {"convs": [], "bns": []}
    fin = node_feature_count
    for _ in range(num_convs):
        key, k1, k2, k3, k4, k5 = jax.random.split(key, 6)
        scale = 1.0 / jnp.sqrt(fin)
        params["convs"].append({
            # stored already transposed: (Fin, E)
            "w_rel":  (jax.random.normal(k1, (fin, node_embedding_dim)) * scale).astype(jnp.float32),
            "w_root": (jax.random.normal(k2, (fin, node_embedding_dim)) * scale).astype(jnp.float32),
            "b_rel":  (jax.random.normal(k3, (node_embedding_dim,)) * 0.1).astype(jnp.float32),
        })
        params["bns"].append({
            "gamma": (1.0 + 0.1 * jax.random.normal(k4, (node_embedding_dim,))).astype(jnp.float32),
            "beta":  (0.1 * jax.random.normal(k5, (node_embedding_dim,))).astype(jnp.float32),
            "mean":  jnp.zeros((node_embedding_dim,), jnp.float32),
            "var":   jnp.ones((node_embedding_dim,), jnp.float32),
        })
        fin = node_embedding_dim
    key, kf1, kf2 = jax.random.split(key, 3)
    d_in = node_embedding_dim * node_count
    params["fc_w"] = (jax.random.normal(kf1, (d_in, output_dim)) / jnp.sqrt(d_in)).astype(jnp.float32)
    params["fc_b"] = (0.1 * jax.random.normal(kf2, (output_dim,))).astype(jnp.float32)
    return params


def flexgcn_reference(params, x, edge_index):
    """Pure-JAX f32 reference of the original (unfolded) forward pass."""
    B, N, _ = x.shape
    adj = edge_index_to_dense_adj(edge_index, N)
    for conv_p, bn_p in zip(params["convs"], params["bns"]):
        agg = jnp.einsum("ij,bjf->bif", adj, x)
        h = agg @ conv_p["w_rel"] + x @ conv_p["w_root"] + conv_p["b_rel"]
        h = (h - bn_p["mean"]) / jnp.sqrt(bn_p["var"] + BN_EPS) * bn_p["gamma"] + bn_p["beta"]
        x = jnp.maximum(h, 0.0)
    x = x.reshape(B, -1)
    return x @ params["fc_w"] + params["fc_b"]


if __name__ == "__main__":
    # Small, deterministic configuration.
    batch = 2
    node_count = 16
    node_feature_count = 8
    node_embedding_dim = 32
    output_dim = 16
    num_convs = 2

    key = jax.random.PRNGKey(0)
    key, kx, kp = jax.random.split(key, 3)

    # Node features (B, N, F).
    x = jax.random.normal(kx, (batch, node_count, node_feature_count), jnp.float32)

    # Bidirectional ring graph in COO format: edge_index shape (2, num_edges).
    nodes = jnp.arange(node_count, dtype=jnp.int32)
    src = jnp.concatenate([nodes, (nodes + 1) % node_count])
    dst = jnp.concatenate([(nodes + 1) % node_count, nodes])
    edge_index = jnp.stack([src, dst], axis=0)

    params = init_flexgcn_params(kp, node_count, node_feature_count,
                                 node_embedding_dim, output_dim, num_convs)

    # One-time folding / packing, hoisted out of the per-call jitted path.
    prep = prepare_flexgcn(params, edge_index, node_count, batch)

    fwd = jax.jit(flexgcn_forward)
    out_pad = jax.block_until_ready(fwd(prep, x))
    out = out_pad[:, :output_dim]                 # drop the lane-padding columns

    ref = flexgcn_reference(params, x, edge_index)
    assert out.shape == (batch, output_dim)
    # bf16 MXU operands with f32 accumulation vs. the f32 reference: expected |err| is a
    # few 1e-2 on O(1) outputs, so the tolerance is correspondingly loose.
    assert jnp.allclose(out, ref, atol=1e-1, rtol=1e-1), "Pallas output mismatch vs reference"

    print("KERNEL_OK")
</pallas_src>

<mosaic_0001>
module attributes {stable_mosaic.version = 11 : i64} {
  func.func @kernel(%arg0: memref<32x8xf32, #tpu.memory_space<vmem>>, %arg1: memref<32x32xbf16, #tpu.memory_space<vmem>>, %arg2: memref<8x32xbf16, #tpu.memory_space<vmem>>, %arg3: memref<8x32xbf16, #tpu.memory_space<vmem>>, %arg4: memref<1x32xf32, #tpu.memory_space<vmem>>, %arg5: memref<32x32xbf16, #tpu.memory_space<vmem>>, %arg6: memref<32x32xbf16, #tpu.memory_space<vmem>>, %arg7: memref<1x32xf32, #tpu.memory_space<vmem>>, %arg8: memref<512x128xbf16, #tpu.memory_space<any>>, %arg9: memref<1x128xf32, #tpu.memory_space<vmem>>, %arg10: memref<2x128xf32, #tpu.memory_space<vmem>>, %arg11: memref<512x128xbf16, #tpu.memory_space<vmem>>, %arg12: memref<!tpu.dma_semaphore, #tpu.memory_space<semaphore_mem>>) attributes {dimension_semantics = [], scalar_prefetch = 0 : i64, scratch_operands = 2 : i64, tpu.core_type = #tpu.core_type<tc>} {
    tpu.enqueue_dma source(%arg8 : memref<512x128xbf16, #tpu.memory_space<any>>) target(%arg11 : memref<512x128xbf16, #tpu.memory_space<vmem>>) target_semaphore(%arg12 : memref<!tpu.dma_semaphore, #tpu.memory_space<semaphore_mem>>)
    %c0 = arith.constant 0 : index
    %c0_0 = arith.constant 0 : index
    %0 = vector.load %arg1[%c0, %c0_0] : memref<32x32xbf16, #tpu.memory_space<vmem>>, vector<32x32xbf16>
    %c0_1 = arith.constant 0 : index
    %c0_2 = arith.constant 0 : index
    %1 = vector.load %arg0[%c0_1, %c0_2] : memref<32x8xf32, #tpu.memory_space<vmem>>, vector<32x8xf32>
    %c0_3 = arith.constant 0 : index
    %c0_4 = arith.constant 0 : index
    %2 = vector.load %arg2[%c0_3, %c0_4] : memref<8x32xbf16, #tpu.memory_space<vmem>>, vector<8x32xbf16>
    %c0_5 = arith.constant 0 : index
    %c0_6 = arith.constant 0 : index
    %3 = vector.load %arg3[%c0_5, %c0_6] : memref<8x32xbf16, #tpu.memory_space<vmem>>, vector<8x32xbf16>
    %c0_7 = arith.constant 0 : index
    %c0_8 = arith.constant 0 : index
    %4 = vector.load %arg4[%c0_7, %c0_8] : memref<1x32xf32, #tpu.memory_space<vmem>>, vector<1x32xf32>
    %5 = arith.truncf %1 : vector<32x8xf32> to vector<32x8xbf16>
    %cst = arith.constant dense<0.000000e+00> : vector<32x8xf32>
    %6 = tpu.matmul %0, %5, %cst {dimension_numbers = #tpu.dot_dimension_numbers<[1], [0], [0], [1], [0, 0, 1, 1], [], []>} : vector<32x32xbf16>, vector<32x8xbf16>, vector<32x8xf32> -> vector<32x8xf32>
    %7 = arith.truncf %6 : vector<32x8xf32> to vector<32x8xbf16>
    %cst_9 = arith.constant dense<0.000000e+00> : vector<32x32xf32>
    %8 = tpu.matmul %7, %2, %cst_9 {dimension_numbers = #tpu.dot_dimension_numbers<[1], [0], [0], [1], [0, 0, 1, 1], [], []>} : vector<32x8xbf16>, vector<8x32xbf16>, vector<32x32xf32> -> vector<32x32xf32>
    %cst_10 = arith.constant dense<0.000000e+00> : vector<32x32xf32>
    %9 = tpu.matmul %5, %3, %cst_10 {dimension_numbers = #tpu.dot_dimension_numbers<[1], [0], [0], [1], [0, 0, 1, 1], [], []>} : vector<32x8xbf16>, vector<8x32xbf16>, vector<32x32xf32> -> vector<32x32xf32>
    %10 = arith.addf %8, %9 : vector<32x32xf32>
    %11 = vector.broadcast %4 : vector<1x32xf32> to vector<32x32xf32>
    %12 = arith.addf %10, %11 : vector<32x32xf32>
    %cst_11 = arith.constant 0.000000e+00 : f32
    %13 = vector.broadcast %cst_11 : f32 to vector<32x32xf32>
    %14 = arith.maximumf %12, %13 : vector<32x32xf32>
    %c0_12 = arith.constant 0 : index
    %c0_13 = arith.constant 0 : index
    %15 = vector.load %arg5[%c0_12, %c0_13] : memref<32x32xbf16, #tpu.memory_space<vmem>>, vector<32x32xbf16>
    %c0_14 = arith.constant 0 : index
    %c0_15 = arith.constant 0 : index
    %16 = vector.load %arg6[%c0_14, %c0_15] : memref<32x32xbf16, #tpu.memory_space<vmem>>, vector<32x32xbf16>
    %c0_16 = arith.constant 0 : index
    %c0_17 = arith.constant 0 : index
    %17 = vector.load %arg7[%c0_16, %c0_17] : memref<1x32xf32, #tpu.memory_space<vmem>>, vector<1x32xf32>
    %18 = arith.truncf %14 : vector<32x32xf32> to vector<32x32xbf16>
    %cst_18 = arith.constant dense<0.000000e+00> : vector<32x32xf32>
    %19 = tpu.matmul %0, %18, %cst_18 {dimension_numbers = #tpu.dot_dimension_numbers<[1], [0], [0], [1], [0, 0, 1, 1], [], []>} : vector<32x32xbf16>, vector<32x32xbf16>, vector<32x32xf32> -> vector<32x32xf32>
    %20 = arith.truncf %19 : vector<32x32xf32> to vector<32x32xbf16>
    %cst_19 = arith.constant dense<0.000000e+00> : vector<32x32xf32>
    %21 = tpu.matmul %20, %15, %cst_19 {dimension_numbers = #tpu.dot_dimension_numbers<[1], [0], [0], [1], [0, 0, 1, 1], [], []>} : vector<32x32xbf16>, vector<32x32xbf16>, vector<32x32xf32> -> vector<32x32xf32>
    %cst_20 = arith.constant dense<0.000000e+00> : vector<32x32xf32>
    %22 = tpu.matmul %18, %16, %cst_20 {dimension_numbers = #tpu.dot_dimension_numbers<[1], [0], [0], [1], [0, 0, 1, 1], [], []>} : vector<32x32xbf16>, vector<32x32xbf16>, vector<32x32xf32> -> vector<32x32xf32>
    %23 = arith.addf %21, %22 : vector<32x32xf32>
    %24 = vector.broadcast %17 : vector<1x32xf32> to vector<32x32xf32>
    %25 = arith.addf %23, %24 : vector<32x32xf32>
    %cst_21 = arith.constant 0.000000e+00 : f32
    %26 = vector.broadcast %cst_21 : f32 to vector<32x32xf32>
    %27 = arith.maximumf %25, %26 : vector<32x32xf32>
    tpu.wait_dma2 semaphore(%arg12 : memref<!tpu.dma_semaphore, #tpu.memory_space<semaphore_mem>>) src(%arg8 : memref<512x128xbf16, #tpu.memory_space<any>>) dst(%arg11 : memref<512x128xbf16, #tpu.memory_space<vmem>>)
    %28 = arith.truncf %27 : vector<32x32xf32> to vector<32x32xbf16>
    %cst_22 = arith.constant 0.000000e+00 : f32
    %29 = vector.broadcast %cst_22 : f32 to vector<2x128xf32>
    %30 = vector.extract_strided_slice %28 {offsets = [0, 0], sizes = [2, 32], strides = [1, 1]} : vector<32x32xbf16> to vector<2x32xbf16>
    %c0_23 = arith.constant 0 : index
    %c0_24 = arith.constant 0 : index
    %31 = vector.load %arg11[%c0_23, %c0_24] : memref<512x128xbf16, #tpu.memory_space<vmem>>, vector<32x128xbf16>
    %cst_25 = arith.constant dense<0.000000e+00> : vector<2x128xf32>
    %32 = tpu.matmul %30, %31, %cst_25 {dimension_numbers = #tpu.dot_dimension_numbers<[1], [0], [0], [1], [0, 0, 1, 1], [], []>} : vector<2x32xbf16>, vector<32x128xbf16>, vector<2x128xf32> -> vector<2x128xf32>
    %33 = arith.addf %29, %32 : vector<2x128xf32>
    %34 = vector.extract_strided_slice %28 {offsets = [2, 0], sizes = [2, 32], strides = [1, 1]} : vector<32x32xbf16> to vector<2x32xbf16>
    %c32 = arith.constant 32 : index
    %c0_26 = arith.constant 0 : index
    %35 = vector.load %arg11[%c32, %c0_26] : memref<512x128xbf16, #tpu.memory_space<vmem>>, vector<32x128xbf16>
    %cst_27 = arith.constant dense<0.000000e+00> : vector<2x128xf32>
    %36 = tpu.matmul %34, %35, %cst_27 {dimension_numbers = #tpu.dot_dimension_numbers<[1], [0], [0], [1], [0, 0, 1, 1], [], []>} : vector<2x32xbf16>, vector<32x128xbf16>, vector<2x128xf32> -> vector<2x128xf32>
    %37 = arith.addf %33, %36 : vector<2x128xf32>
    %38 = vector.extract_strided_slice %28 {offsets = [4, 0], sizes = [2, 32], strides = [1, 1]} : vector<32x32xbf16> to vector<2x32xbf16>
    %c64 = arith.constant 64 : index
    %c0_28 = arith.constant 0 : index
    %39 = vector.load %arg11[%c64, %c0_28] : memref<512x128xbf16, #tpu.memory_space<vmem>>, vector<32x128xbf16>
    %cst_29 = arith.constant dense<0.000000e+00> : vector<2x128xf32>
    %40 = tpu.matmul %38, %39, %cst_29 {dimension_numbers = #tpu.dot_dimension_numbers<[1], [0], [0], [1], [0, 0, 1, 1], [], []>} : vector<2x32xbf16>, vector<32x128xbf16>, vector<2x128xf32> -> vector<2x128xf32>
    %41 = arith.addf %37, %40 : vector<2x128xf32>
    %42 = vector.extract_strided_slice %28 {offsets = [6, 0], sizes = [2, 32], strides = [1, 1]} : vector<32x32xbf16> to vector<2x32xbf16>
    %c96 = arith.constant 96 : index
    %c0_30 = arith.constant 0 : index
    %43 = vector.load %arg11[%c96, %c0_30] : memref<512x128xbf16, #tpu.memory_space<vmem>>, vector<32x128xbf16>
    %cst_31 = arith.constant dense<0.000000e+00> : vector<2x128xf32>
    %44 = tpu.matmul %42, %43, %cst_31 {dimension_numbers = #tpu.dot_dimension_numbers<[1], [0], [0], [1], [0, 0, 1, 1], [], []>} : vector<2x32xbf16>, vector<32x128xbf16>, vector<2x128xf32> -> vector<2x128xf32>
    %45 = arith.addf %41, %44 : vector<2x128xf32>
    %46 = vector.extract_strided_slice %28 {offsets = [8, 0], sizes = [2, 32], strides = [1, 1]} : vector<32x32xbf16> to vector<2x32xbf16>
    %c128 = arith.constant 128 : index
    %c0_32 = arith.constant 0 : index
    %47 = vector.load %arg11[%c128, %c0_32] : memref<512x128xbf16, #tpu.memory_space<vmem>>, vector<32x128xbf16>
    %cst_33 = arith.constant dense<0.000000e+00> : vector<2x128xf32>
    %48 = tpu.matmul %46, %47, %cst_33 {dimension_numbers = #tpu.dot_dimension_numbers<[1], [0], [0], [1], [0, 0, 1, 1], [], []>} : vector<2x32xbf16>, vector<32x128xbf16>, vector<2x128xf32> -> vector<2x128xf32>
    %49 = arith.addf %45, %48 : vector<2x128xf32>
    %50 = vector.extract_strided_slice %28 {offsets = [10, 0], sizes = [2, 32], strides = [1, 1]} : vector<32x32xbf16> to vector<2x32xbf16>
    %c160 = arith.constant 160 : index
    %c0_34 = arith.constant 0 : index
    %51 = vector.load %arg11[%c160, %c0_34] : memref<512x128xbf16, #tpu.memory_space<vmem>>, vector<32x128xbf16>
    %cst_35 = arith.constant dense<0.000000e+00> : vector<2x128xf32>
    %52 = tpu.matmul %50, %51, %cst_35 {dimension_numbers = #tpu.dot_dimension_numbers<[1], [0], [0], [1], [0, 0, 1, 1], [], []>} : vector<2x32xbf16>, vector<32x128xbf16>, vector<2x128xf32> -> vector<2x128xf32>
    %53 = arith.addf %49, %52 : vector<2x128xf32>
    %54 = vector.extract_strided_slice %28 {offsets = [12, 0], sizes = [2, 32], strides = [1, 1]} : vector<32x32xbf16> to vector<2x32xbf16>
    %c192 = arith.constant 192 : index
    %c0_36 = arith.constant 0 : index
    %55 = vector.load %arg11[%c192, %c0_36] : memref<512x128xbf16, #tpu.memory_space<vmem>>, vector<32x128xbf16>
    %cst_37 = arith.constant dense<0.000000e+00> : vector<2x128xf32>
    %56 = tpu.matmul %54, %55, %cst_37 {dimension_numbers = #tpu.dot_dimension_numbers<[1], [0], [0], [1], [0, 0, 1, 1], [], []>} : vector<2x32xbf16>, vector<32x128xbf16>, vector<2x128xf32> -> vector<2x128xf32>
    %57 = arith.addf %53, %56 : vector<2x128xf32>
    %58 = vector.extract_strided_slice %28 {offsets = [14, 0], sizes = [2, 32], strides = [1, 1]} : vector<32x32xbf16> to vector<2x32xbf16>
    %c224 = arith.constant 224 : index
    %c0_38 = arith.constant 0 : index
    %59 = vector.load %arg11[%c224, %c0_38] : memref<512x128xbf16, #tpu.memory_space<vmem>>, vector<32x128xbf16>
    %cst_39 = arith.constant dense<0.000000e+00> : vector<2x128xf32>
    %60 = tpu.matmul %58, %59, %cst_39 {dimension_numbers = #tpu.dot_dimension_numbers<[1], [0], [0], [1], [0, 0, 1, 1], [], []>} : vector<2x32xbf16>, vector<32x128xbf16>, vector<2x128xf32> -> vector<2x128xf32>
    %61 = arith.addf %57, %60 : vector<2x128xf32>
    %62 = vector.extract_strided_slice %28 {offsets = [16, 0], sizes = [2, 32], strides = [1, 1]} : vector<32x32xbf16> to vector<2x32xbf16>
    %c256 = arith.constant 256 : index
    %c0_40 = arith.constant 0 : index
    %63 = vector.load %arg11[%c256, %c0_40] : memref<512x128xbf16, #tpu.memory_space<vmem>>, vector<32x128xbf16>
    %cst_41 = arith.constant dense<0.000000e+00> : vector<2x128xf32>
    %64 = tpu.matmul %62, %63, %cst_41 {dimension_numbers = #tpu.dot_dimension_numbers<[1], [0], [0], [1], [0, 0, 1, 1], [], []>} : vector<2x32xbf16>, vector<32x128xbf16>, vector<2x128xf32> -> vector<2x128xf32>
    %65 = arith.addf %61, %64 : vector<2x128xf32>
    %66 = vector.extract_strided_slice %28 {offsets = [18, 0], sizes = [2, 32], strides = [1, 1]} : vector<32x32xbf16> to vector<2x32xbf16>
    %c288 = arith.constant 288 : index
    %c0_42 = arith.constant 0 : index
    %67 = vector.load %arg11[%c288, %c0_42] : memref<512x128xbf16, #tpu.memory_space<vmem>>, vector<32x128xbf16>
    %cst_43 = arith.constant dense<0.000000e+00> : vector<2x128xf32>
    %68 = tpu.matmul %66, %67, %cst_43 {dimension_numbers = #tpu.dot_dimension_numbers<[1], [0], [0], [1], [0, 0, 1, 1], [], []>} : vector<2x32xbf16>, vector<32x128xbf16>, vector<2x128xf32> -> vector<2x128xf32>
    %69 = arith.addf %65, %68 : vector<2x128xf32>
    %70 = vector.extract_strided_slice %28 {offsets = [20, 0], sizes = [2, 32], strides = [1, 1]} : vector<32x32xbf16> to vector<2x32xbf16>
    %c320 = arith.constant 320 : index
    %c0_44 = arith.constant 0 : index
    %71 = vector.load %arg11[%c320, %c0_44] : memref<512x128xbf16, #tpu.memory_space<vmem>>, vector<32x128xbf16>
    %cst_45 = arith.constant dense<0.000000e+00> : vector<2x128xf32>
    %72 = tpu.matmul %70, %71, %cst_45 {dimension_numbers = #tpu.dot_dimension_numbers<[1], [0], [0], [1], [0, 0, 1, 1], [], []>} : vector<2x32xbf16>, vector<32x128xbf16>, vector<2x128xf32> -> vector<2x128xf32>
    %73 = arith.addf %69, %72 : vector<2x128xf32>
    %74 = vector.extract_strided_slice %28 {offsets = [22, 0], sizes = [2, 32], strides = [1, 1]} : vector<32x32xbf16> to vector<2x32xbf16>
    %c352 = arith.constant 352 : index
    %c0_46 = arith.constant 0 : index
    %75 = vector.load %arg11[%c352, %c0_46] : memref<512x128xbf16, #tpu.memory_space<vmem>>, vector<32x128xbf16>
    %cst_47 = arith.constant dense<0.000000e+00> : vector<2x128xf32>
    %76 = tpu.matmul %74, %75, %cst_47 {dimension_numbers = #tpu.dot_dimension_numbers<[1], [0], [0], [1], [0, 0, 1, 1], [], []>} : vector<2x32xbf16>, vector<32x128xbf16>, vector<2x128xf32> -> vector<2x128xf32>
    %77 = arith.addf %73, %76 : vector<2x128xf32>
    %78 = vector.extract_strided_slice %28 {offsets = [24, 0], sizes = [2, 32], strides = [1, 1]} : vector<32x32xbf16> to vector<2x32xbf16>
    %c384 = arith.constant 384 : index
    %c0_48 = arith.constant 0 : index
    %79 = vector.load %arg11[%c384, %c0_48] : memref<512x128xbf16, #tpu.memory_space<vmem>>, vector<32x128xbf16>
    %cst_49 = arith.constant dense<0.000000e+00> : vector<2x128xf32>
    %80 = tpu.matmul %78, %79, %cst_49 {dimension_numbers = #tpu.dot_dimension_numbers<[1], [0], [0], [1], [0, 0, 1, 1], [], []>} : vector<2x32xbf16>, vector<32x128xbf16>, vector<2x128xf32> -> vector<2x128xf32>
    %81 = arith.addf %77, %80 : vector<2x128xf32>
    %82 = vector.extract_strided_slice %28 {offsets = [26, 0], sizes = [2, 32], strides = [1, 1]} : vector<32x32xbf16> to vector<2x32xbf16>
    %c416 = arith.constant 416 : index
    %c0_50 = arith.constant 0 : index
    %83 = vector.load %arg11[%c416, %c0_50] : memref<512x128xbf16, #tpu.memory_space<vmem>>, vector<32x128xbf16>
    %cst_51 = arith.constant dense<0.000000e+00> : vector<2x128xf32>
    %84 = tpu.matmul %82, %83, %cst_51 {dimension_numbers = #tpu.dot_dimension_numbers<[1], [0], [0], [1], [0, 0, 1, 1], [], []>} : vector<2x32xbf16>, vector<32x128xbf16>, vector<2x128xf32> -> vector<2x128xf32>
    %85 = arith.addf %81, %84 : vector<2x128xf32>
    %86 = vector.extract_strided_slice %28 {offsets = [28, 0], sizes = [2, 32], strides = [1, 1]} : vector<32x32xbf16> to vector<2x32xbf16>
    %c448 = arith.constant 448 : index
    %c0_52 = arith.constant 0 : index
    %87 = vector.load %arg11[%c448, %c0_52] : memref<512x128xbf16, #tpu.memory_space<vmem>>, vector<32x128xbf16>
    %cst_53 = arith.constant dense<0.000000e+00> : vector<2x128xf32>
    %88 = tpu.matmul %86, %87, %cst_53 {dimension_numbers = #tpu.dot_dimension_numbers<[1], [0], [0], [1], [0, 0, 1, 1], [], []>} : vector<2x32xbf16>, vector<32x128xbf16>, vector<2x128xf32> -> vector<2x128xf32>
    %89 = arith.addf %85, %88 : vector<2x128xf32>
    %90 = vector.extract_strided_slice %28 {offsets = [30, 0], sizes = [2, 32], strides = [1, 1]} : vector<32x32xbf16> to vector<2x32xbf16>
    %c480 = arith.constant 480 : index
    %c0_54 = arith.constant 0 : index
    %91 = vector.load %arg11[%c480, %c0_54] : memref<512x128xbf16, #tpu.memory_space<vmem>>, vector<32x128xbf16>
    %cst_55 = arith.constant dense<0.000000e+00> : vector<2x128xf32>
    %92 = tpu.matmul %90, %91, %cst_55 {dimension_numbers = #tpu.dot_dimension_numbers<[1], [0], [0], [1], [0, 0, 1, 1], [], []>} : vector<2x32xbf16>, vector<32x128xbf16>, vector<2x128xf32> -> vector<2x128xf32>
    %93 = arith.addf %89, %92 : vector<2x128xf32>
    %c0_56 = arith.constant 0 : index
    %c0_57 = arith.constant 0 : index
    %94 = vector.load %arg9[%c0_56, %c0_57] : memref<1x128xf32, #tpu.memory_space<vmem>>, vector<1x128xf32>
    %95 = vector.broadcast %94 : vector<1x128xf32> to vector<2x128xf32>
    %96 = arith.addf %93, %95 : vector<2x128xf32>
    %c0_58 = arith.constant 0 : index
    %c0_59 = arith.constant 0 : index
    %97 = vector.load %arg10[%c0_58, %c0_59] : memref<2x128xf32, #tpu.memory_space<vmem>>, vector<2x128xf32>
    tpu.vector_store %arg10[%c0_58, %c0_59], %96 {strides = array<i32>} : memref<2x128xf32, #tpu.memory_space<vmem>>, vector<2x128xf32>,
    return
  }
}

</mosaic_0001>

<bundles_post_ra>
// kernel: flexgcn_forward.1
= control target key start
LH: loop header
LB: loop body
LE: loop exit
PB: predicated region body
PF: predicated region fallthrough
CT: control target
= control target key end

     0   :  { %vm69_vm0 = vcmask 261120   ;;  %vm127_vm1 = vcmask 64512   ;;  %vm134_vm2 = vcmask 1043456   ;;  %s1852_s0 = inlined_call_operand.vmem [shape: f32[32,8], index: 0, kind: input, shape index: {}]   ;;  %s1853_s1 = inlined_call_operand.vmem [shape: bf16[32,32], index: 1, kind: input, shape index: {}]   ;;  %s1854_s2 = inlined_call_operand.vmem [shape: bf16[8,32], index: 2, kind: input, shape index: {}]   ;;  %s1855_s3 = inlined_call_operand.vmem [shape: bf16[8,32], index: 3, kind: input, shape index: {}]   ;;  %s1856_s4 = inlined_call_operand.vmem [shape: f32[1,32], index: 4, kind: input, shape index: {}]   ;;  %s1857_s5 = inlined_call_operand.vmem [shape: bf16[32,32], index: 5, kind: input, shape index: {}]   ;;  %s1858_s6 = inlined_call_operand.vmem [shape: bf16[32,32], index: 6, kind: input, shape index: {}]   ;;  %s1859_s7 = inlined_call_operand.vmem [shape: f32[1,32], index: 7, kind: input, shape index: {}]   ;;  %s1860_s8 = inlined_call_operand.hbm [shape: bf16[512,128], index: 8, kind: input, shape index: {}]   ;;  %s1861_s9 = inlined_call_operand.vmem [shape: f32[1,128], index: 9, kind: input, shape index: {}]   ;;  %s1862_s10 = inlined_call_operand.hbm [shape: f32[2,128], index: 10, kind: output, shape index: {}]  }
   0x1   :  { %v50_v0 = vld [vmem:[%s1852_s0] sm:$0xff]  ;;  %v51_v1 = vld [vmem:[%s1852_s0 + $0x8] sm:$0xff]  ;;  %v52_v2 = vld [vmem:[%s1852_s0 + $0x10] sm:$0xff] }
   0x2   :  { %v57_v3 = vpack.c.bf16 %v51_v1, %v50_v0  ;;  %v53_v4 = vld [vmem:[%s1852_s0 + $0x18] sm:$0xff]  ;;  %v1548_v6 = vld [vmem:[%s1853_s1] sm:$0xff]   ;;  %v1549_v10 = vld [vmem:[%s1853_s1 + $0x8] sm:$0xff]  }
   0x3   :  { %v58_v5 = vpack.c.bf16 %v53_v4, %v52_v2  ;;  %v55_v7 = vld [vmem:[%s1855_s3] sm:$0xf]  ;;  %1366 = vmatprep.mubr.msk.bf16.mxu0 %vm69_vm0, %v1548_v6 }
   0x4   :  { %1362 = vmatprep.subr.bf16.mxu0 %v57_v3  ;;  %1372 = vmatprep.mubr.msk.bf16.mxu1 %vm127_vm1, %v57_v3  ;;  %v54_v8 = vld [vmem:[%s1854_s2] sm:$0xf]  ;;  %v136_v9 = vsel %vm134_vm2, %v55_v7, 0 }
   0x5   :  { %1363 = vmatpush3.bf16.msra.mxu0 %v57_v3  ;;  %1542 = vmatprep.subr.msk.bf16.mxu1 %vm134_vm2, %v55_v7  ;;  %v194_v11 = vsel %vm134_vm2, %v54_v8, 0 }
   0x6   :  { %1364 = vmatprep.subr.bf16.mxu0 %v58_v5  ;;  %1371 = vmatpush3.bf16.msra.mxu1 %v136_v9 }
   0x7   :  { %1543 = vmatprep.subr.msk.bf16.mxu1 %vm134_vm2, %v54_v8 }
   0x8   :  { %15 = vsyncpa [#allocation5], 0  ;;  %v1550_v18 = vld [vmem:[%s1858_s6] sm:$0xff]   ;;  %v1551_v19 = vld [vmem:[%s1858_s6 + $0x8] sm:$0xff]   ;;  %s1602_s13 = smov [#allocation2]   ;;  %s1554_s17 = scalar_lea.hbm %s1860_s8, 4096 }
   0x9   :  { %1365 = vmatpush3.bf16.msra.mxu0 %v58_v5  ;;  %1373 = vmatmul.mubr.msk.bf16.vlgmr.msra.gmra.mrb[0].mxu1 %vm127_vm1, %v58_v5  ;;  %v1552_v20 = vld [vmem:[%s1857_s5] sm:$0xff]   ;;  %v1553_v36 = vld [vmem:[%s1857_s5 + $0x8] sm:$0xff]   ;;  %s42_s14 = sshll.u32 %s1602_s13, 4  ;;  %p1555_p0 = scmp.ne.s32.totalorder %s1860_s8, %s1554_s17  ;;  %s43_s14 = int_to_ptr.vmem [resolvable:$true] %s42_s14 }
   0xa   :  { %1377 = vmatpush3.bf16.msra.mxu1 %v194_v11  ;;  %v1262_v21 = vld [vmem:[%s1856_s4] ss:$0 sm:$0xff]  ;;  %p1558_p1 = scmp.lt.u32.totalorder %s1554_s17, %s1860_s8 }
   0xb   :  { %1390 = vmatprep.subr.bf16.mxu1 %v1550_v18 }
   0xc   :  { %1367 = vmatmul.mubr.msk.bf16.vlgmr.msra.gmra.mrb[0].mxu0 %vm69_vm0, %v1549_v10  ;;  %p1560_p2 = pnand %p1558_p1, %p1555_p0 }
   0xd   :  { %1386 = vmatprep.mubr.msk.bf16.mxu0 %vm69_vm0, %v1548_v6 }
  0xdf   :  { %v1368_v12 = vpop.f32.mrb[0].mxu0 }
  0xe0   :  { %v110_v13 = vpop.f32.mrb[1].mxu0 }
  0xe1   :  { %v1369_v14 = vpop.f32.mrb[2].mxu0 }
  0xe2   :  { %v126_v15 = vpack.c.bf16 %v1369_v14, %v1368_v12  ;;  %v113_v16 = vpop.f32.mrb[3].mxu0 }
  0xe3   :  { %v125_v17 = vpack.c.bf16 %v113_v16, %v110_v13 }
  0xe5   :  { %1378 = vmatprep.mubr.msk.bf16.mxu1 %vm127_vm1, %v125_v17 }
  0xe6   :  { %1379 = vmatmul.mubr.msk.bf16.vlgmr.msra.gmra.mrb[0].mxu1 %vm127_vm1, %v126_v15 }
  0xe7   :  { %1391 = vmatpush3.bf16.msra.mxu1 %v1550_v18 }
  0xe8   :  { %1392 = vmatprep.subr.bf16.mxu1 %v1551_v19 }
  0xeb   :  { %1393 = vmatpush3.bf16.msra.mxu1 %v1551_v19 }
  0xec   :  { %1398 = vmatprep.subr.bf16.mxu1 %v1552_v20 }
 0x1b9   :  { %v1380_v22 = vpop.f32.mrb[0].mxu1 }
 0x1ba   :  { %v253_v23 = vadd.f32 %v1380_v22, %v1262_v21  ;;  %v230_v24 = vpop.f32.mrb[1].mxu1 }
 0x1bb   :  { %v251_v25 = vadd.f32 %v1262_v21, %v230_v24  ;;  %v1381_v26 = vpop.f32.mrb[2].mxu1 }
 0x1bc   :  { %v254_v27 = vadd.f32 %v1381_v26, %v1262_v21  ;;  %v233_v28 = vpop.f32.mrb[3].mxu1  ;;  %v257_v30 = vmax.f32 %v253_v23, 0.0 }
 0x1bd   :  { %v252_v29 = vadd.f32 %v1262_v21, %v233_v28  ;;  %v255_v32 = vmax.f32 %v251_v25, 0.0 }
 0x1be   :  { %v258_v31 = vmax.f32 %v254_v27, 0.0 }
 0x1bf   :  { %v256_v33 = vmax.f32 %v252_v29, 0.0 }
 0x1c0   :  { %v269_v34 = vpack.c.bf16 %v258_v31, %v257_v30 }
 0x1c1   :  { %v268_v35 = vpack.c.bf16 %v256_v33, %v255_v32 }
 0x1c3   :  { %1382 = vmatprep.subr.bf16.mxu0 %v268_v35  ;;  %1394 = vmatprep.mubr.msk.bf16.mxu1 %vm69_vm0, %v268_v35 }
 0x1c4   :  { %1383 = vmatpush3.bf16.msra.mxu0 %v268_v35  ;;  %1395 = vmatmul.mubr.msk.bf16.vlgmr.msra.gmra.mrb[4].mxu1 %vm69_vm0, %v269_v34 }
 0x1c5   :  { %1384 = vmatprep.subr.bf16.mxu0 %v269_v34  ;;  %1399 = vmatpush3.bf16.msra.mxu1 %v1552_v20 }
 0x1c6   :  { %1400 = vmatprep.subr.bf16.mxu1 %v1553_v36 }
 0x1c8   :  { %1385 = vmatpush3.bf16.msra.mxu0 %v269_v34 }
 0x1c9   :  { %1401 = vmatpush3.bf16.msra.mxu1 %v1553_v36 }
 0x1cb   :  { %1387 = vmatmul.mubr.msk.bf16.vlgmr.msra.gmra.mrb[4].mxu0 %vm69_vm0, %v1549_v10 }
 0x29e   :  { %v1388_v37 = vpop.f32.mrb[4].mxu0 }
 0x29f   :  { %v304_v38 = vpop.f32.mrb[5].mxu0 }
 0x2a0   :  { %v1389_v39 = vpop.f32.mrb[6].mxu0 }
 0x2a1   :  { %v320_v40 = vpack.c.bf16 %v1389_v39, %v1388_v37  ;;  %v307_v41 = vpop.f32.mrb[7].mxu0 }
 0x2a2   :  { %v319_v42 = vpack.c.bf16 %v307_v41, %v304_v38 }
 0x2a4   :  { %1402 = vmatprep.mubr.msk.bf16.mxu1 %vm69_vm0, %v319_v42 }
 0x2a5   :  { %1403 = vmatmul.mubr.msk.bf16.vlgmr.msra.gmra.mrb[4].mxu1 %vm69_vm0, %v320_v40 }
 0x2a6   :  { %1563 = shalt.err (!%p1560_p2)  }
 0x2a7   :  { %s1564_s21 = scalar_lea.vmem %s43_s14, 4096  ;;  %p1569_p4 = scmp.lt.s32.totalorder %s43_s14, %s43_s14 }
 0x2a8   :  { %p1565_p3 = scmp.ne.s32.totalorder %s43_s14, %s1564_s21  ;;  %p1570_p5 = scmp.lt.s32.totalorder %s1564_s21, %s1564_s21 }
 0x2aa   :  { %p1571_p6 = por %p1570_p5, %p1569_p4 }
 0x2ac   :  { %p1572_p7 = pnand %p1571_p6, %p1565_p3 }
 0x2ae   :  { %1575 = shalt.err (!%p1572_p7)  }
 0x2af   :  { %45 = dma.hbm_to_vmem [thread:$0]  %s1860_s8, 4096, %s43_s14, [#allocation3]  ;;  %v1273_v43 = vld [vmem:[%s1859_s7] ss:$0 sm:$0xff] }
 0x378   :  { %v1404_v44 = vpop.f32.mrb[4].mxu1 }
 0x379   :  { %v1727_v45 = vadd.f32 %v1404_v44, %v1273_v43  ;;  %v440_v46 = vpop.f32.mrb[5].mxu1 }
 0x37a   :  { %v461_v47 = vadd.f32 %v1273_v43, %v440_v46  ;;  %v1405_v48 = vpop.f32.mrb[6].mxu1 }
 0x37b   :  { %v467_v49 = vmax.f32 %v1727_v45, 0.0  ;;  %v1730_v50 = vadd.f32 %v1405_v48, %v1273_v43  ;;  %v443_v51 = vpop.f32.mrb[7].mxu1 }
 0x37c   :  { %v465_v52 = vmax.f32 %v461_v47, 0.0  ;;  %v462_v53 = vadd.f32 %v1273_v43, %v443_v51 }
 0x37d   :  { %v468_v54 = vmax.f32 %v1730_v50, 0.0 }
 0x37e   :  { %v466_v55 = vmax.f32 %v462_v53, 0.0 }
 0x37f   :  { %1598 = dma.done.wait [#allocation3], 4096 }
 0x380   :  { %1599 = vsyncadd [#allocation3], 4294963200  ;;  %v1603_v56 = vmov 0.0   ;;  %vm1604_vm3 = vmmov 0   ;;  %v477_v57 = vld [vmem:[#allocation2 + $0x10] sm:$0xff]  ;;  %v1739_v58 = vpack.c.bf16 %v466_v55, %v465_v52  ;;  %v567_v59 = vld [vmem:[#allocation2 + $0x20] sm:$0xff]  ;;  %v1785_v17 = vpack.c.bf16 %v468_v54, %v467_v49 }
 0x381   :  { %1406 = vmatprep.subr.bf16.mxu0 %v1603_v56  ;;  %1410 = vmatprep.mubr.msk.bf16.mxu0 %vm1604_vm3, %v1603_v56  ;;  %v478_v60 = vld [vmem:[#allocation2 + $0x18] sm:$0xff]  ;;  %v568_v61 = vld [vmem:[#allocation2 + $0x28] sm:$0xff]  ;;  %v475_v63 = vld [vmem:[#allocation2] sm:$0xff]  ;;  %s1605_s26 = smov [#allocation4]  }
 0x382   :  { %1422 = vmatprep.subr.bf16.mxu1 %v1603_v56  ;;  %1426 = vmatprep.mubr.msk.bf16.mxu1 %vm1604_vm3, %v1603_v56  ;;  %v480_v62 = vrot.slane %v1739_v58, 1  ;;  %v569_v0 = vrot.slane %v1739_v58, 2  ;;  %v661_v1 = vld [vmem:[#allocation2 + $0x40] sm:$0xff]  ;;  %v476_v2 = vld [vmem:[#allocation2 + $0x8] sm:$0xff]  ;;  %v614_v4 = vld [vmem:[#allocation2 + $0x30] sm:$0xff]  ;;  %v663_v5 = vrot.slane %v1739_v58, 4 }
 0x383   :  { %1407 = vmatpush3.bf16.msra.mxu0 %v477_v57  ;;  %1423 = vmatpush3.bf16.msra.mxu1 %v567_v59  ;;  %v662_v3 = vld [vmem:[#allocation2 + $0x48] sm:$0xff]  ;;  %v755_v6 = vld [vmem:[#allocation2 + $0x60] sm:$0xff]  ;;  %v615_v7 = vld [vmem:[#allocation2 + $0x38] sm:$0xff]  ;;  %v616_v8 = vrot.slane %v1739_v58, 3  ;;  %v757_v11 = vrot.slane %v1739_v58, 6  ;;  %v710_v14 = vrot.slane %v1739_v58, 5 }
 0x384   :  { %1408 = vmatprep.subr.bf16.mxu0 %v1603_v56  ;;  %1424 = vmatprep.subr.bf16.mxu1 %v1603_v56  ;;  %v756_v9 = vld [vmem:[#allocation2 + $0x68] sm:$0xff]  ;;  %v708_v10 = vld [vmem:[#allocation2 + $0x50] sm:$0xff]  ;;  %v849_v12 = vld [vmem:[#allocation2 + $0x80] sm:$0xff]  ;;  %v804_v20 = vrot.slane %v1739_v58, 7  ;;  %v945_v23 = vrot.slane %v1785_v17, 2  ;;  %v898_v26 = vrot.slane %v1785_v17, 1 }
 0x385   :  { %v709_v13 = vld [vmem:[#allocation2 + $0x58] sm:$0xff]  ;;  %v850_v15 = vld [vmem:[#allocation2 + $0x88] sm:$0xff]  ;;  %v802_v16 = vld [vmem:[#allocation2 + $0x70] sm:$0xff]  ;;  %v1039_v29 = vrot.slane %v1785_v17, 4  ;;  %v992_v32 = vrot.slane %v1785_v17, 3  ;;  %v1133_v35 = vrot.slane %v1785_v17, 6 }
 0x386   :  { %v943_v18 = vld [vmem:[#allocation2 + $0xa0] sm:$0xff]  ;;  %v803_v19 = vld [vmem:[#allocation2 + $0x78] sm:$0xff]  ;;  %v944_v21 = vld [vmem:[#allocation2 + $0xa8] sm:$0xff]  ;;  %v1086_v37 = vrot.slane %v1785_v17, 5  ;;  %v1180_v40 = vrot.slane %v1785_v17, 7  ;;  %s1240_s0 = sshll.u32 %s1605_s26, 4  ;;  %s1241_s0 = int_to_ptr.vmem [resolvable:$true] %s1240_s0 }
 0x387   :  { %1409 = vmatpush3.bf16.msra.mxu0 %v478_v60  ;;  %1425 = vmatpush3.bf16.msra.mxu1 %v568_v61  ;;  %v895_v22 = vld [vmem:[#allocation2 + $0x90] sm:$0xff]  ;;  %v1037_v24 = vld [vmem:[#allocation2 + $0xc0] sm:$0xff]  ;;  %v896_v25 = vld [vmem:[#allocation2 + $0x98] sm:$0xff]  ;;  %s1576_s27 = scalar_lea.vmem %s1241_s0, 32  ;;  %p1581_p9 = scmp.lt.s32.totalorder %s1241_s0, %s1241_s0 }
 0x388   :  { %1414 = vmatprep.subr.bf16.mxu0 %v1603_v56  ;;  %1438 = vmatprep.subr.bf16.mxu1 %v1603_v56  ;;  %v1038_v27 = vld [vmem:[#allocation2 + $0xc8] sm:$0xff]  ;;  %v990_v28 = vld [vmem:[#allocation2 + $0xb0] sm:$0xff]  ;;  %v1131_v30 = vld [vmem:[#allocation2 + $0xe0] sm:$0xff]  ;;  %p1577_p8 = scmp.ne.s32.totalorder %s1241_s0, %s1576_s27  ;;  %p1582_p10 = scmp.lt.s32.totalorder %s1576_s27, %s1576_s27 }
 0x389   :  { %v991_v31 = vld [vmem:[#allocation2 + $0xb8] sm:$0xff]  ;;  %v1132_v33 = vld [vmem:[#allocation2 + $0xe8] sm:$0xff]  ;;  %v1084_v34 = vld [vmem:[#allocation2 + $0xd0] sm:$0xff] }
 0x38a   :  { %1411 = vmatmul.mubr.msk.bf16.vlgmr.msra.gmra.mrb[8].mxu0 %vm69_vm0, %v480_v62  ;;  %1427 = vmatmul.mubr.msk.bf16.vlgmr.msra.gmra.mrb[8].mxu1 %vm69_vm0, %v569_v0  ;;  %v1085_v36 = vld [vmem:[#allocation2 + $0xd8] sm:$0xff]  ;;  %v1178_v38 = vld [vmem:[#allocation2 + $0xf0] sm:$0xff]  ;;  %p1583_p11 = por %p1582_p10, %p1581_p9 }
 0x38b   :  { %1415 = vmatpush3.bf16.msra.mxu0 %v475_v63  ;;  %1418 = vmatprep.mubr.msk.bf16.mxu0 %vm1604_vm3, %v1603_v56  ;;  %v1179_v39 = vld [vmem:[#allocation2 + $0xf8] sm:$0xff] }
 0x38c   :  { %1416 = vmatprep.subr.bf16.mxu0 %v1603_v56  ;;  %1439 = vmatpush3.bf16.msra.mxu1 %v661_v1  ;;  %p1584_p12 = pnand %p1583_p11, %p1577_p8 }
 0x38d   :  { %1442 = vmatprep.mubr.msk.bf16.mxu1 %vm1604_vm3, %v1603_v56  ;;  %1440 = vmatprep.subr.bf16.mxu1 %v1603_v56 }
 0x38f   :  { %1417 = vmatpush3.bf16.msra.mxu0 %v476_v2 }
 0x390   :  { %1430 = vmatprep.subr.bf16.mxu0 %v1603_v56  ;;  %1441 = vmatpush3.bf16.msra.mxu1 %v662_v3 }
 0x391   :  { %1454 = vmatprep.subr.bf16.mxu1 %v1603_v56 }
 0x392   :  { %1419 = vmatmul.mubr.msk.bf16.vlgmr.msra.gmra.mrb[12].mxu0 %vm69_vm0, %v1739_v58 }
 0x393   :  { %1431 = vmatpush3.bf16.msra.mxu0 %v614_v4  ;;  %1434 = vmatprep.mubr.msk.bf16.mxu0 %vm1604_vm3, %v1603_v56 }
 0x394   :  { %1432 = vmatprep.subr.bf16.mxu0 %v1603_v56  ;;  %1443 = vmatmul.mubr.msk.bf16.vlgmr.msra.gmra.mrb[12].mxu1 %vm69_vm0, %v663_v5 }
 0x395   :  { %1455 = vmatpush3.bf16.msra.mxu1 %v755_v6  ;;  %1458 = vmatprep.mubr.msk.bf16.mxu1 %vm1604_vm3, %v1603_v56 }
 0x396   :  { %1456 = vmatprep.subr.bf16.mxu1 %v1603_v56 }
 0x397   :  { %1433 = vmatpush3.bf16.msra.mxu0 %v615_v7 }
 0x398   :  { %1446 = vmatprep.subr.bf16.mxu0 %v1603_v56 }
 0x399   :  { %1457 = vmatpush3.bf16.msra.mxu1 %v756_v9 }
 0x39a   :  { %1435 = vmatmul.mubr.msk.bf16.vlgmr.msra.gmra.mrb[16].mxu0 %vm69_vm0, %v616_v8  ;;  %1470 = vmatprep.subr.bf16.mxu1 %v1603_v56 }
 0x39b   :  { %1447 = vmatpush3.bf16.msra.mxu0 %v708_v10  ;;  %1450 = vmatprep.mubr.msk.bf16.mxu0 %vm1604_vm3, %v1603_v56 }
 0x39c   :  { %1448 = vmatprep.subr.bf16.mxu0 %v1603_v56  ;;  %1459 = vmatmul.mubr.msk.bf16.vlgmr.msra.gmra.mrb[16].mxu1 %vm69_vm0, %v757_v11 }
 0x39d   :  { %1471 = vmatpush3.bf16.msra.mxu1 %v849_v12  ;;  %1474 = vmatprep.mubr.msk.bf16.mxu1 %vm1604_vm3, %v1603_v56 }
 0x39e   :  { %1472 = vmatprep.subr.bf16.mxu1 %v1603_v56 }
 0x39f   :  { %1449 = vmatpush3.bf16.msra.mxu0 %v709_v13 }
 0x3a0   :  { %1462 = vmatprep.subr.bf16.mxu0 %v1603_v56 }
 0x3a1   :  { %1473 = vmatpush3.bf16.msra.mxu1 %v850_v15 }
 0x3a2   :  { %1451 = vmatmul.mubr.msk.bf16.vlgmr.msra.gmra.mrb[20].mxu0 %vm69_vm0, %v710_v14  ;;  %1486 = vmatprep.subr.bf16.mxu1 %v1603_v56 }
 0x3a3   :  { %1463 = vmatpush3.bf16.msra.mxu0 %v802_v16  ;;  %1466 = vmatprep.mubr.msk.bf16.mxu0 %vm1604_vm3, %v1603_v56 }
 0x3a4   :  { %1464 = vmatprep.subr.bf16.mxu0 %v1603_v56  ;;  %1475 = vmatmul.mubr.msk.bf16.vlgmr.msra.gmra.mrb[20].mxu1 %vm69_vm0, %v1785_v17 }
 0x3a5   :  { %1487 = vmatpush3.bf16.msra.mxu1 %v943_v18  ;;  %1490 = vmatprep.mubr.msk.bf16.mxu1 %vm1604_vm3, %v1603_v56 }
 0x3a6   :  { %1488 = vmatprep.subr.bf16.mxu1 %v1603_v56 }
 0x3a7   :  { %1465 = vmatpush3.bf16.msra.mxu0 %v803_v19 }
 0x3a8   :  { %1478 = vmatprep.subr.bf16.mxu0 %v1603_v56 }
 0x3a9   :  { %1489 = vmatpush3.bf16.msra.mxu1 %v944_v21 }
 0x3aa   :  { %1467 = vmatmul.mubr.msk.bf16.vlgmr.msra.gmra.mrb[24].mxu0 %vm69_vm0, %v804_v20  ;;  %1502 = vmatprep.subr.bf16.mxu1 %v1603_v56 }
 0x3ab   :  { %1479 = vmatpush3.bf16.msra.mxu0 %v895_v22  ;;  %1482 = vmatprep.mubr.msk.bf16.mxu0 %vm1604_vm3, %v1603_v56 }
 0x3ac   :  { %1480 = vmatprep.subr.bf16.mxu0 %v1603_v56  ;;  %1491 = vmatmul.mubr.msk.bf16.vlgmr.msra.gmra.mrb[24].mxu1 %vm69_vm0, %v945_v23 }
 0x3ad   :  { %1503 = vmatpush3.bf16.msra.mxu1 %v1037_v24  ;;  %1506 = vmatprep.mubr.msk.bf16.mxu1 %vm1604_vm3, %v1603_v56 }
 0x3ae   :  { %1504 = vmatprep.subr.bf16.mxu1 %v1603_v56 }
 0x3af   :  { %1481 = vmatpush3.bf16.msra.mxu0 %v896_v25 }
 0x3b0   :  { %1494 = vmatprep.subr.bf16.mxu0 %v1603_v56 }
 0x3b1   :  { %1505 = vmatpush3.bf16.msra.mxu1 %v1038_v27 }
 0x3b2   :  { %1483 = vmatmul.mubr.msk.bf16.vlgmr.msra.gmra.mrb[28].mxu0 %vm69_vm0, %v898_v26  ;;  %1518 = vmatprep.subr.bf16.mxu1 %v1603_v56 }
 0x3b3   :  { %1495 = vmatpush3.bf16.msra.mxu0 %v990_v28  ;;  %1498 = vmatprep.mubr.msk.bf16.mxu0 %vm1604_vm3, %v1603_v56 }
 0x3b4   :  { %1496 = vmatprep.subr.bf16.mxu0 %v1603_v56  ;;  %1507 = vmatmul.mubr.msk.bf16.vlgmr.msra.gmra.mrb[28].mxu1 %vm69_vm0, %v1039_v29 }
 0x3b5   :  { %1519 = vmatpush3.bf16.msra.mxu1 %v1131_v30  ;;  %1522 = vmatprep.mubr.msk.bf16.mxu1 %vm1604_vm3, %v1603_v56 }
 0x3b6   :  { %1520 = vmatprep.subr.bf16.mxu1 %v1603_v56 }
 0x3b7   :  { %1497 = vmatpush3.bf16.msra.mxu0 %v991_v31 }
 0x3b8   :  { %1510 = vmatprep.subr.bf16.mxu0 %v1603_v56 }
 0x3b9   :  { %1521 = vmatpush3.bf16.msra.mxu1 %v1132_v33 }
 0x3ba   :  { %1499 = vmatmul.mubr.msk.bf16.vlgmr.msra.gmra.mrb[32].mxu0 %vm69_vm0, %v992_v32 }
 0x3bb   :  { %1511 = vmatpush3.bf16.msra.mxu0 %v1084_v34  ;;  %1514 = vmatprep.mubr.msk.bf16.mxu0 %vm1604_vm3, %v1603_v56 }
 0x3bc   :  { %1512 = vmatprep.subr.bf16.mxu0 %v1603_v56  ;;  %1523 = vmatmul.mubr.msk.bf16.vlgmr.msra.gmra.mrb[32].mxu1 %vm69_vm0, %v1133_v35 }
 0x3bf   :  { %1513 = vmatpush3.bf16.msra.mxu0 %v1085_v36 }
 0x3c0   :  { %1526 = vmatprep.subr.bf16.mxu0 %v1603_v56 }
 0x3c2   :  { %1515 = vmatmul.mubr.msk.bf16.vlgmr.msra.gmra.mrb[36].mxu0 %vm69_vm0, %v1086_v37 }
 0x3c3   :  { %1527 = vmatpush3.bf16.msra.mxu0 %v1178_v38  ;;  %1530 = vmatprep.mubr.msk.bf16.mxu0 %vm1604_vm3, %v1603_v56 }
 0x3c4   :  { %1528 = vmatprep.subr.bf16.mxu0 %v1603_v56 }
 0x3c7   :  { %1529 = vmatpush3.bf16.msra.mxu0 %v1179_v39 }
 0x3ca   :  { %1531 = vmatmul.mubr.msk.bf16.vlgmr.msra.gmra.mrb[40].mxu0 %vm69_vm0, %v1180_v40 }
 0x45d   :  { %v518_v41 = vpop.f32.mrb[8].mxu0  ;;  %v607_v44 = vpop.f32.mrb[8].mxu1 }
 0x45e   :  { %v1412_v42 = vpop.f32.mrb[9].mxu0  ;;  %v1428_v46 = vpop.f32.mrb[9].mxu1 }
 0x45f   :  { %v521_v43 = vpop.f32.mrb[10].mxu0  ;;  %v610_v47 = vpop.f32.mrb[10].mxu1 }
 0x460   :  { %v1413_v45 = vpop.f32.mrb[11].mxu0  ;;  %v1429_v48 = vpop.f32.mrb[11].mxu1 }
 0x465   :  { %v561_v49 = vpop.f32.mrb[12].mxu0 }
 0x466   :  { %v562_v50 = vadd.f32 %v561_v49, %v518_v41  ;;  %v1420_v51 = vpop.f32.mrb[13].mxu0 }
 0x467   :  { %v564_v52 = vpop.f32.mrb[14].mxu0  ;;  %v701_v53 = vpop.f32.mrb[12].mxu1 }
 0x468   :  { %v613_v54 = vadd.f32 %v607_v44, %v562_v50  ;;  %v1421_v55 = vpop.f32.mrb[15].mxu0  ;;  %v1444_v56 = vpop.f32.mrb[13].mxu1  ;;  %v1290_v52 = vld [vmem:[%s1861_s9] ss:$0 sm:$0xff] }
 0x469   :  { %v704_v57 = vpop.f32.mrb[14].mxu1 }
 0x46a   :  { %v1445_v58 = vpop.f32.mrb[15].mxu1 }
 0x46d   :  { %v654_v59 = vpop.f32.mrb[16].mxu0 }
 0x46e   :  { %v660_v60 = vadd.f32 %v654_v59, %v613_v54  ;;  %v1436_v61 = vpop.f32.mrb[17].mxu0 }
 0x46f   :  { %v657_v62 = vpop.f32.mrb[18].mxu0  ;;  %v795_v63 = vpop.f32.mrb[16].mxu1 }
 0x470   :  { %v707_v0 = vadd.f32 %v701_v53, %v660_v60  ;;  %v1437_v1 = vpop.f32.mrb[19].mxu0  ;;  %v1460_v2 = vpop.f32.mrb[17].mxu1 }
 0x471   :  { %v798_v3 = vpop.f32.mrb[18].mxu1 }
 0x472   :  { %v1461_v4 = vpop.f32.mrb[19].mxu1 }
 0x475   :  { %v748_v5 = vpop.f32.mrb[20].mxu0 }
 0x476   :  { %v754_v6 = vadd.f32 %v748_v5, %v707_v0  ;;  %v1452_v7 = vpop.f32.mrb[21].mxu0 }
 0x477   :  { %v751_v8 = vpop.f32.mrb[22].mxu0  ;;  %v888_v9 = vpop.f32.mrb[20].mxu1 }
 0x478   :  { %v801_v10 = vadd.f32 %v795_v63, %v754_v6  ;;  %v1453_v11 = vpop.f32.mrb[23].mxu0  ;;  %v1476_v12 = vpop.f32.mrb[21].mxu1 }
 0x479   :  { %v891_v13 = vpop.f32.mrb[22].mxu1 }
 0x47a   :  { %v1477_v14 = vpop.f32.mrb[23].mxu1 }
 0x47d   :  { %v842_v15 = vpop.f32.mrb[24].mxu0 }
 0x47e   :  { %v848_v16 = vadd.f32 %v842_v15, %v801_v10  ;;  %v1468_v17 = vpop.f32.mrb[25].mxu0 }
 0x47f   :  { %v845_v18 = vpop.f32.mrb[26].mxu0  ;;  %v983_v19 = vpop.f32.mrb[24].mxu1 }
 0x480   :  { %v894_v20 = vadd.f32 %v888_v9, %v848_v16  ;;  %v1469_v21 = vpop.f32.mrb[27].mxu0  ;;  %v1492_v22 = vpop.f32.mrb[25].mxu1 }
 0x481   :  { %v986_v23 = vpop.f32.mrb[26].mxu1 }
 0x482   :  { %v1493_v24 = vpop.f32.mrb[27].mxu1 }
 0x485   :  { %v936_v25 = vpop.f32.mrb[28].mxu0 }
 0x486   :  { %v942_v26 = vadd.f32 %v936_v25, %v894_v20  ;;  %v1484_v27 = vpop.f32.mrb[29].mxu0 }
 0x487   :  { %v939_v28 = vpop.f32.mrb[30].mxu0  ;;  %v1077_v29 = vpop.f32.mrb[28].mxu1 }
 0x488   :  { %v989_v30 = vadd.f32 %v983_v19, %v942_v26  ;;  %v1485_v31 = vpop.f32.mrb[31].mxu0  ;;  %v1508_v32 = vpop.f32.mrb[29].mxu1 }
 0x489   :  { %v1080_v33 = vpop.f32.mrb[30].mxu1 }
 0x48a   :  { %v1509_v34 = vpop.f32.mrb[31].mxu1 }
 0x48d   :  { %v1030_v35 = vpop.f32.mrb[32].mxu0 }
 0x48e   :  { %v1036_v36 = vadd.f32 %v1030_v35, %v989_v30  ;;  %v1500_v37 = vpop.f32.mrb[33].mxu0 }
 0x48f   :  { %v1033_v38 = vpop.f32.mrb[34].mxu0  ;;  %v1171_v39 = vpop.f32.mrb[32].mxu1 }
 0x490   :  { %v1083_v40 = vadd.f32 %v1077_v29, %v1036_v36  ;;  %v1501_v41 = vpop.f32.mrb[35].mxu0  ;;  %v1524_v42 = vpop.f32.mrb[33].mxu1 }
 0x491   :  { %v1174_v43 = vpop.f32.mrb[34].mxu1 }
 0x492   :  { %v1525_v44 = vpop.f32.mrb[35].mxu1 }
 0x495   :  { %v1124_v45 = vpop.f32.mrb[36].mxu0 }
 0x496   :  { %v1130_v46 = vadd.f32 %v1124_v45, %v1083_v40  ;;  %v1516_v47 = vpop.f32.mrb[37].mxu0 }
 0x497   :  { %v1127_v48 = vpop.f32.mrb[38].mxu0 }
 0x498   :  { %v1177_v49 = vadd.f32 %v1171_v39, %v1130_v46  ;;  %v1517_v50 = vpop.f32.mrb[39].mxu0 }
 0x49d   :  { %v1218_v51 = vpop.f32.mrb[40].mxu0 }
 0x49e   :  { %v1224_v53 = vadd.f32 %v1218_v51, %v1177_v49  ;;  %v1532_v54 = vpop.f32.mrb[41].mxu0 }
 0x49f   :  { %v1221_v55 = vpop.f32.mrb[42].mxu0 }
 0x4a0   :  { %v1232_v56 = vadd.f32 %v1290_v52, %v1224_v53  ;;  %v1533_v57 = vpop.f32.mrb[43].mxu0 }
 0x4a2   :  { %1233 = vst [vmem:[#allocation4] sm:$0x3] %v1232_v56 }
 0x4a3   :  { %1587 = shalt.err (!%p1584_p12)
}
 0x4a4   :  { %s1588_s9 = scalar_lea.hbm %s1862_s10, 32 }
 0x4a5   :  { %p1589_p13 = scmp.ne.s32.totalorder %s1862_s10, %s1588_s9  ;;  %p1592_p0 = scmp.lt.u32.totalorder %s1588_s9, %s1862_s10 }
 0x4a7   :  { %p1594_p1 = pnand %p1592_p0, %p1589_p13 }
 0x4a9   :  { %1597 = shalt.err (!%p1594_p1)
}
 0x4aa   :  { %1243 = dma.vmem_to_hbm [thread:$0]  %s1241_s0, 32, %s1862_s10, [#allocation5]  }
 0x4ab   :  { %1600 = dma.done.wait [#allocation5], 32  }
 0x4ac   :  { %1601 = vsyncadd [#allocation5], 4294967264 }
 0x4ad   :  { %1247 = vsyncpa [#allocation5], 1 }
 0x4ae   :  { %1248 = vsyncmov [#allocation3] }
 0x4b1   :  { %s1249_s4 = vpop.sfrf %1248 }
 0x4b2   :  { %p1291_p2 = scmp.ne.s32.totalorder %s1249_s4, 0 }
 0x4b4   :  { %1253 = shalt.err (%p1291_p2)  }

</bundles_post_ra>
